<compile_context>
chip_gen: v7x
topology: tpu7x:2x2x1
jax: 0.10.0
libtpu: 0.0.40
codegen_flags: <defaults>
</compile_context>

<pallas_src>
import functools

import numpy as np
import jax
import jax.numpy as jnp
from jax.experimental import pallas as pl
from jax.experimental.pallas import tpu as pltpu

_MIB = 1024 * 1024
DEFAULT_MASK_VALUE = -1e30  # finite "-inf": avoids NaN on fully-masked rows


def _scp_attention_kernel(*refs, scale, has_prev, has_attn_mask, has_kpm,
                          emit_scores, compute_dtype, approx_reciprocal):
    it = iter(refs)
    q_ref = next(it)                                 # (1, HB, TQ, d_k)
    k_ref = next(it)                                 # (1, HB, d_k, S)
    v_ref = next(it)                                 # (1, HB, S, d_v)
    prev_ref = next(it) if has_prev else None        # (1, HB, TQ, S)
    am_ref = next(it) if has_attn_mask else None     # (1, 1, TQ, S)
    kpm_ref = next(it) if has_kpm else None          # (1, 1, 1, S)
    out_ref = next(it)                               # (1, HB, TQ, d_v)
    attn_ref = next(it)                              # (1, HB, TQ, S)
    scores_ref = next(it) if emit_scores else None   # (1, HB, TQ, S)

    # Fold the scale into q (TQ*d_k multiplies instead of TQ*S) and run the
    # MXU in compute_dtype (bf16 by default) with f32 accumulation.
    qh = (q_ref[0].astype(jnp.float32) * scale).astype(compute_dtype)
    kh = k_ref[0].astype(compute_dtype)

    # QK^T on the MXU, batched over heads.
    s = jnp.einsum("hqd,hds->hqs", qh, kh, preferred_element_type=jnp.float32)
    if has_prev:
        s = s + prev_ref[0].astype(jnp.float32)
    if has_attn_mask:
        s = s + am_ref[0].astype(jnp.float32)        # (1, TQ, S) bcast over heads
    if has_kpm:
        s = s + kpm_ref[0, 0].astype(jnp.float32)    # (1, S) bcast over heads/rows
    if emit_scores:
        scores_ref[0] = s.astype(scores_ref.dtype)

    # Numerically stable softmax over seq_len.  `s` is rebound at each step so
    # only one (HB, TQ, S) f32 slab is live at a time (bounded VMEM/vreg
    # pressure -> no spill traffic competing with the DMA pipeline).
    m = jnp.max(s, axis=-1, keepdims=True)
    s = jnp.exp(s - m)
    denom = jnp.sum(s, axis=-1, keepdims=True)
    if approx_reciprocal:
        inv = pl.reciprocal(denom, approx=True)      # EUP slot, ~free
    else:
        inv = 1.0 / denom
    s = s * inv                                      # softmax weights, f32
    # TODO(synk): attn_dropout is identity here (p=0.0 / eval); no RNG dropout.
    attn_ref[0] = s.astype(attn_ref.dtype)

    # P @ V on the MXU, batched over heads.
    o = jnp.einsum("hqs,hsd->hqd", s.astype(compute_dtype),
                   v_ref[0].astype(compute_dtype),
                   preferred_element_type=jnp.float32)
    out_ref[0] = o.astype(out_ref.dtype)


def _vmem_block_bytes(h_blk, q_blk, *, seq_len, d_k, d_v, q_bytes, k_bytes,
                      v_bytes, prev_bytes, am_bytes, out_bytes, attn_bytes,
                      scores_bytes, has_prev, has_am, has_kpm, emit_scores,
                      compute_bytes, kv_buffers=2, stream_buffers=2):
    """Estimated per-step VMEM footprint (pipelined blocks + live intermediates)."""
    total = 0
    total += stream_buffers * h_blk * q_blk * d_k * q_bytes           # q
    total += kv_buffers * h_blk * d_k * seq_len * k_bytes             # k (q-resident)
    total += kv_buffers * h_blk * seq_len * d_v * v_bytes             # v (q-resident)
    if has_prev:
        total += stream_buffers * h_blk * q_blk * seq_len * prev_bytes
    if has_am:
        total += stream_buffers * q_blk * seq_len * am_bytes
    if has_kpm:
        total += stream_buffers * seq_len * 4
    total += stream_buffers * h_blk * q_blk * d_v * out_bytes         # out
    total += stream_buffers * h_blk * q_blk * seq_len * attn_bytes    # attn
    if emit_scores:
        total += stream_buffers * h_blk * q_blk * seq_len * scores_bytes
    # Live in-kernel intermediates: one f32 (HB,TQ,S) slab + one compute copy.
    total += h_blk * q_blk * seq_len * (4 + compute_bytes)
    return total


def _choose_tiles(n_heads, q_len, budget_bytes, bytes_fn):
    """Pick (h_block, q_block): biggest combo that fits the VMEM budget."""
    def _divisors(n):
        return [d for d in range(1, n + 1) if n % d == 0]

    h_cands = _divisors(n_heads)
    # (8,128) rule: q_block must be a multiple of 8 or the full q_len.
    q_cands = [qb for qb in _divisors(q_len) if qb == q_len or qb % 8 == 0]
    combos = [(hb, qb) for hb in h_cands for qb in q_cands]
    fitting = [c for c in combos if bytes_fn(*c) <= budget_bytes]
    if fitting:
        # Biggest block that fits; prefer a large q tile (MXU M dim) over heads.
        return max(fitting, key=lambda c: (c[0] * c[1], c[1], c[0]))
    # Nothing fits the target: take the minimum footprint and rely on headroom.
    return min(combos, key=lambda c: bytes_fn(*c))


def scp_attention(q, k, v, prev=None, key_padding_mask=None, attn_mask=None,
                  *, scale, res_attention=True, q_block=None, h_block=None,
                  compute_dtype=jnp.bfloat16, attn_dtype=None,
                  scores_dtype=None, mask_dtype=jnp.float32,
                  mask_value=DEFAULT_MASK_VALUE, approx_reciprocal=True,
                  target_vmem_bytes=36 * _MIB, vmem_limit_bytes=None,
                  kv_single_buffer=False):
    """Pallas implementation of SCPAttention.forward (dropout disabled)."""
    bs, n_heads, q_len, d_k = q.shape
    seq_len = k.shape[-1]
    d_v = v.shape[-1]
    out_dtype = q.dtype
    attn_dtype = out_dtype if attn_dtype is None else attn_dtype
    scores_dtype = out_dtype if scores_dtype is None else scores_dtype
    emit_scores = bool(res_attention)

    has_prev = prev is not None
    has_am = attn_mask is not None
    has_kpm = key_padding_mask is not None

    bytes_fn = functools.partial(
        _vmem_block_bytes, seq_len=seq_len, d_k=d_k, d_v=d_v,
        q_bytes=np.dtype(q.dtype).itemsize, k_bytes=np.dtype(k.dtype).itemsize,
        v_bytes=np.dtype(v.dtype).itemsize,
        prev_bytes=(np.dtype(prev.dtype).itemsize if has_prev else 0),
        am_bytes=np.dtype(mask_dtype).itemsize,
        out_bytes=np.dtype(out_dtype).itemsize,
        attn_bytes=np.dtype(attn_dtype).itemsize,
        scores_bytes=np.dtype(scores_dtype).itemsize,
        has_prev=has_prev, has_am=has_am, has_kpm=has_kpm,
        emit_scores=emit_scores,
        compute_bytes=np.dtype(compute_dtype).itemsize,
        kv_buffers=1 if kv_single_buffer else 2)

    auto_h, auto_q = _choose_tiles(n_heads, q_len, target_vmem_bytes, bytes_fn)
    h_block = auto_h if h_block is None else int(h_block)
    q_block = auto_q if q_block is None else int(q_block)
    assert n_heads % h_block == 0, "h_block must divide n_heads"
    assert q_len % q_block == 0, "q_block must divide q_len"
    assert q_block == q_len or q_block % 8 == 0, "q_block must be a multiple of 8"
    n_ht = n_heads // h_block
    n_qt = q_len // q_block

    if vmem_limit_bytes is None:
        need = bytes_fn(h_block, q_block)
        # Always pass an explicit limit (defaults are 16/32 MiB); cap at the
        # smallest physical VMEM across generations (v7x: 64 MiB per TC).
        vmem_limit_bytes = int(min(64 * _MIB, max(32 * _MIB, int(need * 1.25))))

    kv_kwargs = {}
    if kv_single_buffer:
        # k/v index_maps are constant along the q-tile axis; a single buffer
        # trades one exposed DMA per (b, h) step for H*(d_k+d_v)*S*bytes VMEM.
        kv_kwargs = dict(pipeline_mode=pl.Buffered(1))

    inputs = [q, k, v]
    in_specs = [
        pl.BlockSpec((1, h_block, q_block, d_k), lambda b, h, t: (b, h, t, 0)),
        pl.BlockSpec((1, h_block, d_k, seq_len), lambda b, h, t: (b, h, 0, 0),
                     **kv_kwargs),
        pl.BlockSpec((1, h_block, seq_len, d_v), lambda b, h, t: (b, h, 0, 0),
                     **kv_kwargs),
    ]
    if has_prev:
        inputs.append(prev)
        in_specs.append(pl.BlockSpec((1, h_block, q_block, seq_len),
                                     lambda b, h, t: (b, h, t, 0)))
    if has_am:
        am = attn_mask
        if am.dtype == jnp.bool_:
            am = jnp.where(am, mask_value, 0.0)
        am = am.astype(mask_dtype)
        while am.ndim < 4:
            am = am[None]
        am = jnp.broadcast_to(am, (1, 1, q_len, seq_len))
        inputs.append(am)
        in_specs.append(pl.BlockSpec((1, 1, q_block, seq_len),
                                     lambda b, h, t: (0, 0, t, 0)))
    if has_kpm:
        # Tiny additive bias instead of a full scores-sized HBM tensor.
        kpm_bias = jnp.where(key_padding_mask[:, None, None, :],
                             mask_value, 0.0).astype(jnp.float32)
        inputs.append(kpm_bias)
        in_specs.append(pl.BlockSpec((1, 1, 1, seq_len),
                                     lambda b, h, t: (b, 0, 0, 0)))

    out_shapes = [
        jax.ShapeDtypeStruct((bs, n_heads, q_len, d_v), out_dtype),
        jax.ShapeDtypeStruct((bs, n_heads, q_len, seq_len), attn_dtype),
    ]
    out_specs = [
        pl.BlockSpec((1, h_block, q_block, d_v), lambda b, h, t: (b, h, t, 0)),
        pl.BlockSpec((1, h_block, q_block, seq_len), lambda b, h, t: (b, h, t, 0)),
    ]
    if emit_scores:
        out_shapes.append(
            jax.ShapeDtypeStruct((bs, n_heads, q_len, seq_len), scores_dtype))
        out_specs.append(pl.BlockSpec((1, h_block, q_block, seq_len),
                                      lambda b, h, t: (b, h, t, 0)))

    kernel = functools.partial(
        _scp_attention_kernel, scale=float(scale), has_prev=has_prev,
        has_attn_mask=has_am, has_kpm=has_kpm, emit_scores=emit_scores,
        compute_dtype=compute_dtype,
        approx_reciprocal=bool(approx_reciprocal))

    results = pl.pallas_call(
        kernel,
        out_shape=tuple(out_shapes),
        grid_spec=pltpu.PrefetchScalarGridSpec(
            num_scalar_prefetch=0,
            grid=(bs, n_ht, n_qt),
            in_specs=in_specs,
            out_specs=out_specs,
        ),
        compiler_params=pltpu.CompilerParams(
            dimension_semantics=("parallel", "parallel", "parallel"),
            vmem_limit_bytes=int(vmem_limit_bytes)),
    )(*inputs)

    out, attn = results[0], results[1]
    if emit_scores:
        return out, attn, results[2]
    return out, attn


if __name__ == "__main__":
    # Module config: d_model=32, n_heads=4 -> head_dim=8, scale = 8**-0.5, lsa=False.
    bs, n_heads, q_len, seq_len = 2, 4, 8, 8
    d_model = 32
    d_k = d_model // n_heads
    d_v = d_k
    # TODO(synk): trainable LSA scale would need to be fed as a runtime scalar;
    # here it is the deterministic constant (lsa=False).
    scale = d_k ** (-0.5)

    key = jax.random.PRNGKey(0)
    kq, kk, kv, kp, km = jax.random.split(key, 5)
    q = jax.random.normal(kq, (bs, n_heads, q_len, d_k), dtype=jnp.float32)
    k = jax.random.normal(kk, (bs, n_heads, d_k, seq_len), dtype=jnp.float32)
    v = jax.random.normal(kv, (bs, n_heads, seq_len, d_v), dtype=jnp.float32)
    prev = 0.1 * jax.random.normal(kp, (bs, n_heads, q_len, seq_len),
                                   dtype=jnp.float32)
    attn_mask = 0.05 * jax.random.normal(km, (1, q_len, seq_len), dtype=jnp.float32)
    key_padding_mask = jnp.zeros((bs, seq_len), dtype=jnp.bool_).at[1, -1].set(True)

    # Pure-JAX reference (uses the same finite mask value as the kernel).
    bias = (prev + attn_mask[:, None, :, :]
            + jnp.where(key_padding_mask[:, None, None, :],
                        DEFAULT_MASK_VALUE, 0.0))
    rs = jnp.einsum("bhqd,bhds->bhqs", q, k,
                    precision=jax.lax.Precision.HIGHEST) * scale + bias
    rw = jax.nn.softmax(rs, axis=-1)
    ro = jnp.einsum("bhqs,bhsd->bhqd", rw, v,
                    precision=jax.lax.Precision.HIGHEST)

    # 1) f32 compute, exact reciprocal, auto tiles.
    out1, attn1, scores1 = scp_attention(
        q, k, v, prev=prev, key_padding_mask=key_padding_mask,
        attn_mask=attn_mask, scale=scale, res_attention=True,
        compute_dtype=jnp.float32, approx_reciprocal=False)
    jax.block_until_ready((out1, attn1, scores1))
    assert jnp.allclose(scores1, rs, atol=3e-2, rtol=3e-2), "scores mismatch"
    assert jnp.allclose(attn1, rw, atol=3e-2, rtol=3e-2), "attn mismatch"
    assert jnp.allclose(out1, ro, atol=3e-2, rtol=3e-2), "output mismatch"

    # 2) Same numerics but head-tiled grid (h_block=2) -> must match run 1.
    out2, attn2, scores2 = scp_attention(
        q, k, v, prev=prev, key_padding_mask=key_padding_mask,
        attn_mask=attn_mask, scale=scale, res_attention=True,
        compute_dtype=jnp.float32, approx_reciprocal=False,
        h_block=2, q_block=q_len)
    jax.block_until_ready((out2, attn2, scores2))
    assert jnp.allclose(scores2, scores1, atol=1e-6, rtol=1e-6), "tiled scores mismatch"
    assert jnp.allclose(attn2, attn1, atol=1e-6, rtol=1e-6), "tiled attn mismatch"
    assert jnp.allclose(out2, out1, atol=1e-6, rtol=1e-6), "tiled output mismatch"

    # 3) Default fast path: bf16 MXU, approx reciprocal, scores output dropped.
    res3 = scp_attention(
        q, k, v, prev=prev, key_padding_mask=key_padding_mask,
        attn_mask=attn_mask, scale=scale, res_attention=False)
    assert len(res3) == 2, "res_attention=False must return (out, attn)"
    out3, attn3 = res3
    jax.block_until_ready((out3, attn3))
    assert jnp.allclose(attn3, rw, atol=5e-2, rtol=5e-2), "bf16 attn mismatch"
    assert jnp.allclose(out3, ro, atol=8e-2, rtol=8e-2), "bf16 output mismatch"

    print("KERNEL_OK")
</pallas_src>

<mosaic_0001>
module attributes {stable_mosaic.version = 11 : i64} {
  func.func @_scp_attention_kernel(%arg0: i32, %arg1: i32, %arg2: i32, %arg3: memref<1x4x8x8xf32, #tpu.memory_space<vmem>>, %arg4: memref<1x4x8x8xf32, #tpu.memory_space<vmem>>, %arg5: memref<1x4x8x8xf32, #tpu.memory_space<vmem>>, %arg6: memref<1x4x8x8xf32, #tpu.memory_space<vmem>>, %arg7: memref<1x1x8x8xf32, #tpu.memory_space<vmem>>, %arg8: memref<1x1x1x8xf32, #tpu.memory_space<vmem>>, %arg9: memref<1x4x8x8xf32, #tpu.memory_space<vmem>>, %arg10: memref<1x4x8x8xf32, #tpu.memory_space<vmem>>, %arg11: memref<1x4x8x8xf32, #tpu.memory_space<vmem>>) attributes {dimension_semantics = [#tpu.dimension_semantics<parallel>, #tpu.dimension_semantics<parallel>, #tpu.dimension_semantics<parallel>], iteration_bounds = array<i64: 2, 1, 1>, scalar_prefetch = 0 : i64, scratch_operands = 0 : i64, tpu.core_type = #tpu.core_type<tc>, window_params = [{transform_indices = @transform_0, window_bounds = array<i64: 1, 4, 8, 8>}, {transform_indices = @transform_1, window_bounds = array<i64: 1, 4, 8, 8>}, {transform_indices = @transform_2, window_bounds = array<i64: 1, 4, 8, 8>}, {transform_indices = @transform_3, window_bounds = array<i64: 1, 4, 8, 8>}, {transform_indices = @transform_4, window_bounds = array<i64: 1, 1, 8, 8>}, {transform_indices = @transform_5, window_bounds = array<i64: 1, 1, 1, 8>}, {transform_indices = @transform_6, window_bounds = array<i64: 1, 4, 8, 8>}, {transform_indices = @transform_7, window_bounds = array<i64: 1, 4, 8, 8>}, {transform_indices = @transform_8, window_bounds = array<i64: 1, 4, 8, 8>}]} {
    %c0 = arith.constant 0 : index
    %c0_0 = arith.constant 0 : index
    %c0_1 = arith.constant 0 : index
    %c0_2 = arith.constant 0 : index
    %0 = vector.load %arg3[%c0, %c0_0, %c0_1, %c0_2] : memref<1x4x8x8xf32, #tpu.memory_space<vmem>>, vector<1x4x8x8xf32>
    %1 = vector.shape_cast %0 : vector<1x4x8x8xf32> to vector<4x8x8xf32>
    %cst = arith.constant 0.353553385 : f32
    %2 = vector.broadcast %cst : f32 to vector<4x8x8xf32>
    %3 = arith.mulf %1, %2 : vector<4x8x8xf32>
    %c0_3 = arith.constant 0 : index
    %c0_4 = arith.constant 0 : index
    %c0_5 = arith.constant 0 : index
    %c0_6 = arith.constant 0 : index
    %4 = vector.load %arg4[%c0_3, %c0_4, %c0_5, %c0_6] : memref<1x4x8x8xf32, #tpu.memory_space<vmem>>, vector<1x4x8x8xf32>
    %5 = vector.shape_cast %4 : vector<1x4x8x8xf32> to vector<4x8x8xf32>
    "tpu.trace_start"() <{level = 10 : i32, message = "hqd,hds->hqs"}> : () -> ()
    %cst_7 = arith.constant dense<0.000000e+00> : vector<4x8x8xf32>
    %6 = tpu.matmul %3, %5, %cst_7 {dimension_numbers = #tpu.dot_dimension_numbers<[2], [1], [1], [2], [0, 0, 0, 1, 1, 2], [0], [0]>} : vector<4x8x8xf32>, vector<4x8x8xf32>, vector<4x8x8xf32> -> vector<4x8x8xf32>
    "tpu.trace_stop"() : () -> ()
    %c0_8 = arith.constant 0 : index
    %c0_9 = arith.constant 0 : index
    %c0_10 = arith.constant 0 : index
    %c0_11 = arith.constant 0 : index
    %7 = vector.load %arg6[%c0_8, %c0_9, %c0_10, %c0_11] : memref<1x4x8x8xf32, #tpu.memory_space<vmem>>, vector<1x4x8x8xf32>
    %8 = vector.shape_cast %7 : vector<1x4x8x8xf32> to vector<4x8x8xf32>
    %9 = arith.addf %6, %8 : vector<4x8x8xf32>
    %c0_12 = arith.constant 0 : index
    %c0_13 = arith.constant 0 : index
    %c0_14 = arith.constant 0 : index
    %c0_15 = arith.constant 0 : index
    %10 = vector.load %arg7[%c0_12, %c0_13, %c0_14, %c0_15] : memref<1x1x8x8xf32, #tpu.memory_space<vmem>>, vector<1x1x8x8xf32>
    %11 = vector.shape_cast %10 : vector<1x1x8x8xf32> to vector<1x8x8xf32>
    %12 = vector.broadcast %11 : vector<1x8x8xf32> to vector<4x8x8xf32>
    %13 = arith.addf %9, %12 : vector<4x8x8xf32>
    %c0_16 = arith.constant 0 : index
    %c0_17 = arith.constant 0 : index
    %c0_18 = arith.constant 0 : index
    %c0_19 = arith.constant 0 : index
    %14 = vector.load %arg8[%c0_16, %c0_17, %c0_18, %c0_19] : memref<1x1x1x8xf32, #tpu.memory_space<vmem>>, vector<1x1x1x8xf32>
    %15 = vector.shape_cast %14 : vector<1x1x1x8xf32> to vector<1x8xf32>
    %16 = vector.shape_cast %15 : vector<1x8xf32> to vector<1x1x8xf32>
    %17 = vector.broadcast %16 : vector<1x1x8xf32> to vector<4x8x8xf32>
    %18 = arith.addf %13, %17 : vector<4x8x8xf32>
    %c0_20 = arith.constant 0 : index
    %c0_21 = arith.constant 0 : index
    %c0_22 = arith.constant 0 : index
    %c0_23 = arith.constant 0 : index
    %19 = vector.load %arg11[%c0_20, %c0_21, %c0_22, %c0_23] : memref<1x4x8x8xf32, #tpu.memory_space<vmem>>, vector<1x4x8x8xf32>
    %20 = vector.shape_cast %19 : vector<1x4x8x8xf32> to vector<4x8x8xf32>
    %21 = vector.shape_cast %18 : vector<4x8x8xf32> to vector<1x4x8x8xf32>
    tpu.vector_store %arg11[%c0_20, %c0_21, %c0_22, %c0_23], %21 {strides = array<i32>} : memref<1x4x8x8xf32, #tpu.memory_space<vmem>>, vector<1x4x8x8xf32>,
    %cst_24 = arith.constant dense<0xFF800000> : vector<4x8xf32>
    %22 = vector.multi_reduction <maximumf>, %18, %cst_24 [2] : vector<4x8x8xf32> to vector<4x8xf32>
    %23 = vector.shape_cast %22 : vector<4x8xf32> to vector<4x8x1xf32>
    %24 = vector.broadcast %23 : vector<4x8x1xf32> to vector<4x8x8xf32>
    %25 = arith.subf %18, %24 : vector<4x8x8xf32>
    %26 = math.exp %25 : vector<4x8x8xf32>
    %cst_25 = arith.constant dense<0.000000e+00> : vector<4x8xf32>
    %27 = vector.multi_reduction <add>, %26, %cst_25 [2] : vector<4x8x8xf32> to vector<4x8xf32>
    %28 = vector.shape_cast %27 : vector<4x8xf32> to vector<4x8x1xf32>
    %cst_26 = arith.constant 1.000000e+00 : f32
    %29 = vector.broadcast %cst_26 : f32 to vector<4x8x1xf32>
    %30 = arith.divf %29, %28 : vector<4x8x1xf32>
    %31 = vector.broadcast %30 : vector<4x8x1xf32> to vector<4x8x8xf32>
    %32 = arith.mulf %26, %31 : vector<4x8x8xf32>
    %c0_27 = arith.constant 0 : index
    %c0_28 = arith.constant 0 : index
    %c0_29 = arith.constant 0 : index
    %c0_30 = arith.constant 0 : index
    %33 = vector.load %arg10[%c0_27, %c0_28, %c0_29, %c0_30] : memref<1x4x8x8xf32, #tpu.memory_space<vmem>>, vector<1x4x8x8xf32>
    %34 = vector.shape_cast %33 : vector<1x4x8x8xf32> to vector<4x8x8xf32>
    %35 = vector.shape_cast %32 : vector<4x8x8xf32> to vector<1x4x8x8xf32>
    tpu.vector_store %arg10[%c0_27, %c0_28, %c0_29, %c0_30], %35 {strides = array<i32>} : memref<1x4x8x8xf32, #tpu.memory_space<vmem>>, vector<1x4x8x8xf32>,
    %c0_31 = arith.constant 0 : index
    %c0_32 = arith.constant 0 : index
    %c0_33 = arith.constant 0 : index
    %c0_34 = arith.constant 0 : index
    %36 = vector.load %arg5[%c0_31, %c0_32, %c0_33, %c0_34] : memref<1x4x8x8xf32, #tpu.memory_space<vmem>>, vector<1x4x8x8xf32>
    %37 = vector.shape_cast %36 : vector<1x4x8x8xf32> to vector<4x8x8xf32>
    "tpu.trace_start"() <{level = 10 : i32, message = "hqs,hsd->hqd"}> : () -> ()
    %cst_35 = arith.constant dense<0.000000e+00> : vector<4x8x8xf32>
    %38 = tpu.matmul %32, %37, %cst_35 {dimension_numbers = #tpu.dot_dimension_numbers<[2], [1], [1], [2], [0, 0, 0, 1, 1, 2], [0], [0]>} : vector<4x8x8xf32>, vector<4x8x8xf32>, vector<4x8x8xf32> -> vector<4x8x8xf32>
    "tpu.trace_stop"() : () -> ()
    %c0_36 = arith.constant 0 : index
    %c0_37 = arith.constant 0 : index
    %c0_38 = arith.constant 0 : index
    %c0_39 = arith.constant 0 : index
    %39 = vector.load %arg9[%c0_36, %c0_37, %c0_38, %c0_39] : memref<1x4x8x8xf32, #tpu.memory_space<vmem>>, vector<1x4x8x8xf32>
    %40 = vector.shape_cast %39 : vector<1x4x8x8xf32> to vector<4x8x8xf32>
    %41 = vector.shape_cast %38 : vector<4x8x8xf32> to vector<1x4x8x8xf32>
    tpu.vector_store %arg9[%c0_36, %c0_37, %c0_38, %c0_39], %41 {strides = array<i32>} : memref<1x4x8x8xf32, #tpu.memory_space<vmem>>, vector<1x4x8x8xf32>,
    return
  }
  func.func @transform_0(%arg0: i32, %arg1: i32, %arg2: i32) -> (i32, i32, i32, i32) {
    %c0_i32 = arith.constant 0 : i32
    %c0_i32_0 = arith.constant 0 : i32
    return %arg0, %arg1, %arg2, %c0_i32 : i32, i32, i32, i32
  }
  func.func @transform_1(%arg0: i32, %arg1: i32, %arg2: i32) -> (i32, i32, i32, i32) {
    %c0_i32 = arith.constant 0 : i32
    %c0_i32_0 = arith.constant 0 : i32
    %c0_i32_1 = arith.constant 0 : i32
    return %arg0, %arg1, %c0_i32, %c0_i32_0 : i32, i32, i32, i32
  }
  func.func @transform_2(%arg0: i32, %arg1: i32, %arg2: i32) -> (i32, i32, i32, i32) {
    %c0_i32 = arith.constant 0 : i32
    %c0_i32_0 = arith.constant 0 : i32
    %c0_i32_1 = arith.constant 0 : i32
    return %arg0, %arg1, %c0_i32, %c0_i32_0 : i32, i32, i32, i32
  }
  func.func @transform_3(%arg0: i32, %arg1: i32, %arg2: i32) -> (i32, i32, i32, i32) {
    %c0_i32 = arith.constant 0 : i32
    %c0_i32_0 = arith.constant 0 : i32
    return %arg0, %arg1, %arg2, %c0_i32 : i32, i32, i32, i32
  }
  func.func @transform_4(%arg0: i32, %arg1: i32, %arg2: i32) -> (i32, i32, i32, i32) {
    %c0_i32 = arith.constant 0 : i32
    %c0_i32_0 = arith.constant 0 : i32
    %c0_i32_1 = arith.constant 0 : i32
    %c0_i32_2 = arith.constant 0 : i32
    return %c0_i32, %c0_i32_0, %arg2, %c0_i32_1 : i32, i32, i32, i32
  }
  func.func @transform_5(%arg0: i32, %arg1: i32, %arg2: i32) -> (i32, i32, i32, i32) {
    %c0_i32 = arith.constant 0 : i32
    %c0_i32_0 = arith.constant 0 : i32
    %c0_i32_1 = arith.constant 0 : i32
    %c0_i32_2 = arith.constant 0 : i32
    return %arg0, %c0_i32, %c0_i32_0, %c0_i32_1 : i32, i32, i32, i32
  }
  func.func @transform_6(%arg0: i32, %arg1: i32, %arg2: i32) -> (i32, i32, i32, i32) {
    %c0_i32 = arith.constant 0 : i32
    %c0_i32_0 = arith.constant 0 : i32
    return %arg0, %arg1, %arg2, %c0_i32 : i32, i32, i32, i32
  }
  func.func @transform_7(%arg0: i32, %arg1: i32, %arg2: i32) -> (i32, i32, i32, i32) {
    %c0_i32 = arith.constant 0 : i32
    %c0_i32_0 = arith.constant 0 : i32
    return %arg0, %arg1, %arg2, %c0_i32 : i32, i32, i32, i32
  }
  func.func @transform_8(%arg0: i32, %arg1: i32, %arg2: i32) -> (i32, i32, i32, i32) {
    %c0_i32 = arith.constant 0 : i32
    %c0_i32_0 = arith.constant 0 : i32
    return %arg0, %arg1, %arg2, %c0_i32 : i32, i32, i32, i32
  }
}

</mosaic_0001>

<bundles_post_ra>
// kernel: tpu_custom_call.1
= control target key start
LH: loop header
LB: loop body
LE: loop exit
PB: predicated region body
PF: predicated region fallthrough
CT: control target
= control target key end

     0   :  { %s2598_s0 = inlined_call_operand.hbm [shape: f32[2,4,8,8], index: 0, kind: input, shape index: {}]   ;;  %s2599_s1 = inlined_call_operand.hbm [shape: f32[2,4,8,8], index: 1, kind: input, shape index: {}]   ;;  %s2600_s2 = inlined_call_operand.hbm [shape: f32[2,4,8,8], index: 2, kind: input, shape index: {}]   ;;  %s2601_s3 = inlined_call_operand.hbm [shape: f32[2,4,8,8], index: 3, kind: input, shape index: {}]   ;;  %s2602_s4 = inlined_call_operand.vmem [shape: f32[1,1,8,8], index: 4, kind: input, shape index: {}]   ;;  %s2603_s5 = inlined_call_operand.vmem [shape: f32[2,1,1,8], index: 5, kind: input, shape index: {}]   ;;  %s2604_s6 = inlined_call_operand.hbm [shape: f32[2,4,8,8], index: 6, kind: output, shape index: {0}]   ;;  %s2605_s7 = inlined_call_operand.hbm [shape: f32[2,4,8,8], index: 7, kind: output, shape index: {1}]   ;;  %s2606_s8 = inlined_call_operand.hbm [shape: f32[2,4,8,8], index: 8, kind: output, shape index: {2}]  }
   0x1   :  { %2623 = sst [smem:[#allocation26_spill]] %s2598_s0 }
   0x2   :  { %2624 = sst [smem:[#allocation27_spill]] %s2599_s1 }
   0x3   :  { %2625 = sst [smem:[#allocation28_spill]] %s2604_s6 }
   0x4   :  { %2626 = sst [smem:[#allocation29_spill]] %s2606_s8 }
   0x5   :  { %14 = vsyncpa [#allocation3], 0 }
   0x6   :  { %16 = vsyncpa [#allocation3 + $0x1], 0 }
   0x7   :  { %17 = vsyncpa [#allocation6], 0 }
   0x8   :  { %19 = vsyncpa [#allocation6 + $0x1], 0 }
   0x9   :  { %20 = vsyncpa [#allocation9], 0 }
   0xa   :  { %22 = vsyncpa [#allocation9 + $0x1], 0 }
   0xb   :  { %23 = vsyncpa [#allocation4], 0 }
   0xc   :  { %25 = vsyncpa [#allocation4 + $0x1], 0 }
   0xd   :  { %26 = vsyncpa [#allocation12], 0 }
   0xe   :  { %28 = vsyncpa [#allocation12 + $0x1], 0  ;;  %s2104_s27 = smov 0   ;;  %s2106_s28 = smov 0  }
   0xf   :  { %s2108_s29 = smov 0   ;;  %s2110_s30 = smov 0  }
  0x10   :  { %s2112_s9 = smov 0   ;;  %s2114_s10 = smov 0  }
  0x11 LB: > { %2627 = sst [smem:[#allocation19_spill]] %s2024_s27  ;;  %s2135_s11 = sadd.s32 4294967295, %s2044_s10   ;;  %s2044_s10 = sphi %s2114_s10, %s34_s10   ;;  %s2040_s9 = sphi %s2112_s9, %s2663_s9   ;;  %s2036_s30 = sphi %s2110_s30, %s2662_s30   ;;  %s2032_s29 = sphi %s2108_s29, %s2661_s29   ;;  %s2028_s28 = sphi %s2106_s28, %s2665_s28   ;;  %s2024_s27 = sphi %s2104_s27, %s2664_s27  }
  0x12   : > { %2628 = sst [smem:[#allocation20_spill]] %s2032_s29  ;;  %s2607_s12 = sadd.s32 4294967294, %s2044_s10  }
  0x13   : > { %2629 = sst [smem:[#allocation21_spill]] %s2040_s9  ;;  %s53_s13 = sadd.s32 1, %s2040_s9 }
  0x14   : > { %2630 = sst [smem:[#allocation22_spill]] %s2044_s10  ;;  %s64_s14 = sadd.s32 1, %s2032_s29 }
  0x15   : > { %p55_p0 = scmp.ge.s32.totalorder %s53_s13, 2  ;;  %p71_p1 = scmp.ne.s32.totalorder %s2032_s29, %s2028_s28 }
  0x16   : > { %p72_p2 = scmp.eq.s32.totalorder %s2044_s10, 0  ;;  %p77_p3 = scmp.ne.s32.totalorder %s2028_s28, %s2024_s27 }
  0x17   : > { %s2667_s13 = smov (%p55_p0, %s53_s13), 0  ;;  %p78_p5 = scmp.eq.s32.totalorder %s2135_s11, 0 }
  0x18   : > { %2631 = sst [smem:[#allocation23_spill]] %s2667_s13  ;;  %p2147_p4 = por %p72_p2, %p71_p1 }
  0x19   : > { %s57_s16 = ssub.s32 %s2040_s9, %s2667_s13  ;;  %p243_p6 = scmp.eq.s32.totalorder %s2135_s11, 1 }
  0x1a   : > { %p62_p7 = scmp.eq.s32.totalorder %s57_s16, 0  ;;  %p2155_p8 = por %p78_p5, %p77_p3 }
  0x1b   : > { %p2159_p9 = por %p243_p6, %p71_p1  ;;  %p249_p10 = scmp.eq.s32.totalorder %s2607_s12, 1 }
  0x1c   : > { %s2633_s17 = scalar_select %p2155_p8, 1, 0 }
  0x1d   : > { %s2634_s18 = scalar_select %p2159_p9, 1, 0 }
  0x1e   : > { %s2166_s19 = scalar_select %p62_p7, %s2032_s29, %s64_s14  }
  0x1f   : > { %p2168_p11 = por %p249_p10, %p77_p3  ;;  %p1702_p13 = scmp.lt.s32.totalorder %s2044_s10, 2 }
  0x20   : > { %2635 = sst [smem:[#allocation24_spill]] %s2166_s19  ;;  %s2175_s21 = sand.u32 1, %s2032_s29  }
  0x21   : > { %s2636_s20 = scalar_select %p2168_p11, 1, 0 }
  0x22   : > { %s2178_s22 = sshll.u32 %s2175_s21, 5  ;;  %s2181_s23 = sshll.u32 %s2040_s9, 9 }
  0x23   : > { %2637 = sst [smem:[#allocation25_spill]] %s2636_s20  ;;  %p2185_p0 = pnand %p1702_p13, %p2147_p4 }
  0x24   : > { %s360_s25 = sand.u32 1, %s2044_s10   ;;  %s2639_s1 = sld [smem:[#allocation27_spill]] }
  0x25   : > { %s364_s12 = scalar_lea.vmem [#allocation5], %s2178_s22  ;;  %s2201_s15 = scalar_lea.sflag [#allocation6], %s360_s25 }
  0x26   : > { %s373_s13 = sshll.u32 %s364_s12, 4  ;;  %p2207_p4 = pneg %p2185_p0  ;;  %s2198_s13 = int_to_ptr.vmem [resolvable:$true] %s373_s13 }
  0x2a   : > { %s2194_s16 = scalar_lea.hbm %s2639_s1, %s2181_s23  ;;  %s1779_s12 = scalar_lea.hbm %s2639_s1, 1024 }
  0x2b   : > { %s1774_s9 = scalar_lea.hbm %s2194_s16, 512  ;;  %p1780_p7 = scmp.lt.u32.totalorder %s2194_s16, %s2639_s1 }
  0x2c   : > { %p1775_p3 = scmp.ne.s32.totalorder %s2194_s16, %s1774_s9  ;;  %p1781_p10 = scmp.lt.u32.totalorder %s1779_s12, %s1774_s9 }
  0x2d   : > { %p1783_p12 = scmp.lt.u32.totalorder %s1774_s9, %s2194_s16 }
  0x2e   : > { %p1777_p5 = pnand %p2207_p4, %p1775_p3  ;;  %p1782_p13 = por %p1781_p10, %p1780_p7 }
  0x30   : > { %p1778_p6 = pneg %p1777_p5  ;;  %p1784_p1 = por %p1783_p12, %p1782_p13 }
  0x32   : > { %p1785_p2 = pnand %p1784_p1, %p1778_p6 }
  0x34   : > { %1788 = shalt.err (!%p1785_p2)
}
  0x35   : > { %s1789_s25 = scalar_lea.vmem %s2198_s13, 512  ;;  %s2046_s26 = smov [#allocation5]  }
  0x36   : > { %p1790_p3 = scmp.ne.s32.totalorder %s2198_s13, %s1789_s25  ;;  %s1794_s14 = sshll.u32 %s2046_s26, 4  ;;  %s1795_s14 = int_to_ptr.vmem [resolvable:$false] %s1794_s14 }
  0x37   : > { %s1796_s29 = scalar_lea.vmem %s1795_s14, 1024  ;;  %p1797_p9 = scmp.lt.s32.totalorder %s2198_s13, %s1795_s14 }
  0x38   : > { %p1792_p5 = pnand %p1790_p3, %p2207_p4  ;;  %p1798_p8 = scmp.lt.s32.totalorder %s1796_s29, %s1789_s25 }
  0x3a   : > { %p1793_p11 = pneg %p1792_p5  ;;  %p1799_p7 = por %p1798_p8, %p1797_p9 }
  0x3c   : > { %p1800_p10 = pnand %p1799_p7, %p1793_p11 }
  0x3e   : > { %1803 = shalt.err (!%p1800_p10)
}
  0x3f   : > { %s2614_s9 = smov 128   ;;  %s2616_s20 = smov 8  }
  0x40   : > { %1685 = dma.hbm_to_vmem [thread:$0]  (!%p2185_p0), %s2194_s16, 512, %s2198_s13, %s2201_s15, %s2614_s9, %s2614_s9, %s2616_s20  }
  0x41   : > { %p2641_p8 = scmp.lt.s32.totalorder %s2044_s10, 3  ;;  %p2642_p9 = scmp.ge.s32.totalorder %s2044_s10, 1 }
  0x42   : > { %s2644_s0 = sld [smem:[#allocation26_spill]]  ;;  %s340_s29 = scalar_lea.vmem [#allocation2], %s2178_s22 }
  0x43   : > { %p2238_p11 = pnand %p2642_p9, %p2641_p8  ;;  %s350_s1 = sshll.u32 %s340_s29, 4  ;;  %s2249_s1 = int_to_ptr.vmem [resolvable:$true] %s350_s1 }
  0x44   : > { %s2255_s9 = scalar_lea.hbm %s2600_s2, %s2181_s23  ;;  %s337_s20 = scalar_lea.sflag [#allocation3], %s2175_s21 }
  0x45   : > { %s2643_s12 = scalar_select %p2238_p11, 1, 0 }
  0x48   : > { %s2246_s14 = scalar_lea.hbm %s2644_s0, %s2181_s23  ;;  %s1809_s27 = scalar_lea.hbm %s2644_s0, 1024 }
  0x49   : > { %s1804_s10 = scalar_lea.hbm %s2246_s14, 512  ;;  %p1810_p6 = scmp.lt.u32.totalorder %s2246_s14, %s2644_s0 }
  0x4a   : > { %p1805_p12 = scmp.ne.s32.totalorder %s2246_s14, %s1804_s10  ;;  %p1811_p13 = scmp.lt.u32.totalorder %s1809_s27, %s1804_s10 }
  0x4b   : > { %p1813_p5 = scmp.lt.u32.totalorder %s1804_s10, %s2246_s14 }
  0x4c   : > { %p1807_p1 = pnand %p1805_p12, %p2207_p4  ;;  %p1812_p3 = por %p1811_p13, %p1810_p6 }
  0x4e   : > { %p1808_p2 = pneg %p1807_p1  ;;  %p1814_p7 = por %p1813_p5, %p1812_p3 }
  0x50   : > { %p1815_p10 = pnand %p1814_p7, %p1808_p2 }
  0x52   : > { %1818 = shalt.err (!%p1815_p10)
}
  0x53   : > { %s1819_s29 = scalar_lea.vmem %s2249_s1, 512  ;;  %s2049_s13 = smov [#allocation2]  }
  0x54   : > { %p1820_p8 = scmp.ne.s32.totalorder %s2249_s1, %s1819_s29  ;;  %s1824_s16 = sshll.u32 %s2049_s13, 4  ;;  %s1825_s16 = int_to_ptr.vmem [resolvable:$false] %s1824_s16 }
  0x55   : > { %s1826_s6 = scalar_lea.vmem %s1825_s16, 1024  ;;  %p1827_p1 = scmp.lt.s32.totalorder %s2249_s1, %s1825_s16 }
  0x56   : > { %p1822_p9 = pnand %p1820_p8, %p2207_p4  ;;  %p1828_p11 = scmp.lt.s32.totalorder %s1826_s6, %s1819_s29 }
  0x58   : > { %p1823_p12 = pneg %p1822_p9  ;;  %p1829_p6 = por %p1828_p11, %p1827_p1 }
  0x5a   : > { %p1830_p13 = pnand %p1829_p6, %p1823_p12 }
  0x5c   : > { %1833 = shalt.err (!%p1830_p13)
}
  0x5d   : > { %s2645_s8 = smov 8   ;;  %s2646_s27 = smov 128  }
  0x5e   : > { %1682 = dma.hbm_to_vmem [thread:$0]  (!%p2185_p0), %s2246_s14, 512, %s2249_s1, %s337_s20, %s2646_s27, %s2646_s27, %s2645_s8  }
  0x5f   : > { %s387_s10 = scalar_lea.vmem [#allocation7], %s2178_s22  ;;  %s1834_s26 = scalar_lea.hbm %s2255_s9, 512 }
  0x60   : > { %s396_s25 = sshll.u32 %s387_s10, 4  ;;  %p1835_p11 = scmp.ne.s32.totalorder %s2255_s9, %s1834_s26  ;;  %s2285_s25 = int_to_ptr.vmem [resolvable:$true] %s396_s25 }
  0x61   : > { %s1839_s16 = scalar_lea.hbm %s2600_s2, 1024  ;;  %p1840_p5 = scmp.lt.u32.totalorder %s2255_s9, %s2600_s2 }
  0x62   : > { %p1837_p2 = pnand %p1835_p11, %p2207_p4  ;;  %p1841_p7 = scmp.lt.u32.totalorder %s1839_s16, %s1834_s26 }
  0x63   : > { %p1843_p8 = scmp.lt.u32.totalorder %s1834_s26, %s2255_s9 }
  0x64   : > { %p1838_p3 = pneg %p1837_p2  ;;  %p1842_p10 = por %p1841_p7, %p1840_p5 }
  0x66   : > { %p1844_p9 = por %p1843_p8, %p1842_p10 }
  0x68   : > { %p1845_p12 = pnand %p1844_p9, %p1838_p3 }
  0x6a   : > { %1848 = shalt.err (!%p1845_p12)
}
  0x6b   : > { %s1849_s1 = scalar_lea.vmem %s2285_s25, 512  ;;  %s2050_s20 = smov [#allocation7]  }
  0x6c   : > { %p1850_p1 = scmp.ne.s32.totalorder %s2285_s25, %s1849_s1  ;;  %s1854_s14 = sshll.u32 %s2050_s20, 4  ;;  %s1855_s14 = int_to_ptr.vmem [resolvable:$false] %s1854_s14 }
  0x6d   : > { %s1856_s0 = scalar_lea.vmem %s1855_s14, 1024  ;;  %p1857_p11 = scmp.lt.s32.totalorder %s2285_s25, %s1855_s14 }
  0x6e   : > { %p1852_p6 = pnand %p1850_p1, %p2207_p4  ;;  %p1858_p2 = scmp.lt.s32.totalorder %s1856_s0, %s1849_s1 }
  0x70   : > { %p1853_p13 = pneg %p1852_p6  ;;  %p1859_p5 = por %p1858_p2, %p1857_p11 }
  0x72   : > { %p1860_p7 = pnand %p1859_p5, %p1853_p13 }
  0x74   : > { %1863 = shalt.err (!%p1860_p7)
}
  0x75   : > { %1688 = dma.hbm_to_vmem [thread:$0]  (!%p2185_p0), %s2255_s9, 512, %s2285_s25, %s2201_s15, %s2646_s27, %s2646_s27, %s2645_s8  }
  0x76   : > { %s2316_s29 = scalar_lea.hbm %s2601_s3, %s2181_s23  ;;  %s410_s13 = scalar_lea.vmem [#allocation8], %s2178_s22 }
  0x77   : > { %s420_s16 = sshll.u32 %s410_s13, 4  ;;  %s407_s6 = scalar_lea.sflag [#allocation9], %s2175_s21  ;;  %s2319_s16 = int_to_ptr.vmem [resolvable:$true] %s420_s16 }
  0x78   : > { %s1864_s1 = scalar_lea.hbm %s2316_s29, 512  ;;  %s1869_s25 = scalar_lea.hbm %s2601_s3, 1024 }
  0x79   : > { %p1865_p3 = scmp.ne.s32.totalorder %s2316_s29, %s1864_s1  ;;  %p1870_p9 = scmp.lt.u32.totalorder %s2316_s29, %s2601_s3 }
  0x7a   : > { %p1871_p12 = scmp.lt.u32.totalorder %s1869_s25, %s1864_s1  ;;  %p1873_p6 = scmp.lt.u32.totalorder %s1864_s1, %s2316_s29 }
  0x7b   : > { %p1867_p10 = pnand %p1865_p3, %p2207_p4 }
  0x7c   : > { %p1872_p1 = por %p1871_p12, %p1870_p9 }
  0x7d   : > { %p1868_p8 = pneg %p1867_p10 }
  0x7e   : > { %p1874_p13 = por %p1873_p6, %p1872_p1 }
  0x80   : > { %p1875_p11 = pnand %p1874_p13, %p1868_p8 }
  0x82   : > { %1878 = shalt.err (!%p1875_p11)
}
  0x83   : > { %s1879_s22 = scalar_lea.vmem %s2319_s16, 512  ;;  %s2051_s14 = smov [#allocation8]  }
  0x84   : > { %p1880_p2 = scmp.ne.s32.totalorder %s2319_s16, %s1879_s22  ;;  %s1884_s0 = sshll.u32 %s2051_s14, 4  ;;  %s1885_s0 = int_to_ptr.vmem [resolvable:$false] %s1884_s0 }
  0x85   : > { %s1886_s10 = scalar_lea.vmem %s1885_s0, 1024  ;;  %p1887_p3 = scmp.lt.s32.totalorder %s2319_s16, %s1885_s0 }
  0x86   : > { %p1882_p5 = pnand %p1880_p2, %p2207_p4  ;;  %p1888_p10 = scmp.lt.s32.totalorder %s1886_s10, %s1879_s22 }
  0x88   : > { %p1883_p7 = pneg %p1882_p5  ;;  %p1889_p9 = por %p1888_p10, %p1887_p3 }
  0x8a   : > { %p1890_p12 = pnand %p1889_p9, %p1883_p7 }
  0x8c   : > { %1893 = shalt.err (!%p1890_p12)
}
  0x8d   : > { %1691 = dma.hbm_to_vmem [thread:$0]  (!%p2185_p0), %s2316_s29, 512, %s2319_s16, %s407_s6, %s2646_s27, %s2646_s27, %s2645_s8  }
  0x8e   : > { %p2647_p4 = scmp.ne.s32.totalorder %s2643_s12, 0 }
  0x8f   : > { %s2351_s19 = sand.u32 (!%p2647_p4), 1, %s2028_s28   ;;  %p2648_p8 = scmp.ne.s32.totalorder (!%p2647_p4), %s2633_s17, 0 }
  0x90   : > { %438 = sbr.rel (%p2647_p4) target bundleno = 928 (0x3a0), region = 44  ;;  %s2354_s26 = sshll.u32 (!%p2647_p4), %s2351_s19, 5 }
  0x91   : > { %s441_s24 = scalar_lea.sflag (!%p2647_p4), [#allocation3], %s2351_s19  ;;  %s2358_s13 = scalar_lea.vmem (!%p2647_p4), [#allocation2], %s2354_s26 }
  0x97   : > { %2003 = dma.done.wait (%p2648_p8), %s441_s24, 512  }
  0x98   : > { %2005 = vsyncadd (%p2648_p8), %s441_s24, 4294966784  ;;  %s449_s21 = sand.u32 1, %s2135_s11   ;;  %s453_s8 = scalar_lea.vmem [#allocation5], %s2354_s26 }
  0x99   : > { %s450_s12 = scalar_lea.sflag [#allocation6], %s449_s21 }
  0x9a   : > { %2007 = dma.done.wait (%p2648_p8), %s450_s12, 1024  }
  0x9b   : > { %2009 = vsyncadd (%p2648_p8), %s450_s12, 4294966272  ;;  %s2373_s27 = scalar_lea.vmem [#allocation7], %s2354_s26  ;;  %s468_s29 = scalar_lea.sflag [#allocation9], %s2351_s19 }
  0x9c   : > { %s2377_s16 = scalar_lea.vmem [#allocation8], %s2354_s26 }
  0x9d   : > { %2011 = dma.done.wait (%p2648_p8), %s468_s29, 512  }
  0x9e   : > { %2013 = vsyncadd (%p2648_p8), %s468_s29, 4294966784  ;;  %v2052_v0 = vmov 0.0   ;;  %vm2053_vm0 = vmmov 0   ;;  %v558_v1 = vld [vmem:[%s453_s8] sm:$0xff]  ;;  %vm566_vm1 = vcmask 64512   ;;  %v560_v3 = vld [vmem:[%s453_s8 + $0x10] sm:$0xff] }
  0x9f   : > { %1625 = vmatprep.subr.mxu0 %v2052_v0  ;;  %1627 = vmatprep.mubr.msk.f32.mxu0 %vm2053_vm0, %v2052_v0  ;;  %v550_v2 = vld [vmem:[%s2358_s13] sm:$0xff]  ;;  %v559_v5 = vld [vmem:[%s453_s8 + $0x8] sm:$0xff]  ;;  %v552_v7 = vld [vmem:[%s2358_s13 + $0x10] sm:$0xff]  ;;  %p544_p0 = scmp.lt.s32.totalorder %s2036_s30, 1  ;;  %s2423_s23 = scalar_lea.vmem [#allocation13], %s2354_s26 }
  0xa0   : > { %1630 = vmatprep.subr.mxu1 %v2052_v0  ;;  %1632 = vmatprep.mubr.msk.f32.mxu1 %vm2053_vm0, %v2052_v0  ;;  %v554_v4 = vmul.f32 0.35355338, %v550_v2  ;;  %v551_v6 = vld [vmem:[%s2358_s13 + $0x8] sm:$0xff]  ;;  %v561_v9 = vld [vmem:[%s453_s8 + $0x18] sm:$0xff]  ;;  %v556_v11 = vmul.f32 0.35355338, %v552_v7 }
  0xa1   : > { %1626 = vmatpush3.msra.mxu0 %v558_v1  ;;  %1631 = vmatpush3.msra.mxu1 %v559_v5  ;;  %v555_v8 = vmul.f32 0.35355338, %v551_v6  ;;  %v553_v10 = vld [vmem:[%s2358_s13 + $0x18] sm:$0xff]  ;;  %s545_s17 = scalar_select %p544_p0, %s2036_s30, 1  ;;  %v562_v13 = vld [vmem:[%s2377_s16] sm:$0xff]  ;;  %v563_v14 = vld [vmem:[%s2377_s16 + $0x8] sm:$0xff] }
  0xa2   : > { %1635 = vmatprep.subr.mxu0 %v2052_v0  ;;  %1628 = vmatmul.mubr.msk.f32.vlgmr.msra.gmra.mrb[0].mxu0 %vm566_vm1, %v554_v4  ;;  %v557_v12 = vmul.f32 0.35355338, %v553_v10  ;;  %v859_v16 = vld [vmem:[%s2602_s4] sm:$0xff]  ;;  %v564_v23 = vld [vmem:[%s2377_s16 + $0x10] sm:$0xff]  ;;  %v565_v25 = vld [vmem:[%s2377_s16 + $0x18] sm:$0xff]  ;;  %s528_s20 = scalar_lea.vmem [#allocation11], %s2354_s26 }
  0xa3   : > { %1640 = vmatprep.subr.mxu1 %v2052_v0  ;;  %1636 = vmatpush3.msra.mxu0 %v560_v3  ;;  %s546_s15 = scalar_lea.vmem %s2603_s5, %s545_s17  ;;  %v931_v63 = vld [vmem:[%s2373_s27] sm:$0xff]  ;;  %v932_v1 = vld [vmem:[%s2373_s27 + $0x8] sm:$0xff]  ;;  %s1296_s22 = sshll.u32 %s2423_s23, 4  ;;  %s2460_s22 = int_to_ptr.vmem [resolvable:$true] %s1296_s22 }
  0xa4   : > { %1633 = vmatmul.mubr.msk.f32.vlgmr.msra.gmra.mrb[0].mxu1 %vm566_vm1, %v555_v8  ;;  %1637 = vmatprep.mubr.msk.f32.mxu0 %vm2053_vm0, %v2052_v0  ;;  %v1586_v21 = vld [vmem:[%s546_s15] ss:$0 sm:$0xff]  ;;  %v933_v8 = vld [vmem:[%s2373_s27 + $0x10] sm:$0xff]  ;;  %s2463_s14 = sshll.u32 %s2036_s30, 9  ;;  %s1277_s0 = sshll.u32 %s528_s20, 4  ;;  %s2471_s0 = int_to_ptr.vmem [resolvable:$true] %s1277_s0 }
  0xa5   : > { %1641 = vmatpush3.msra.mxu1 %v561_v9  ;;  %1642 = vmatprep.mubr.msk.f32.mxu1 %vm2053_vm0, %v2052_v0  ;;  %s2469_s13 = scalar_lea.hbm %s2605_s7, %s2463_s14  ;;  %s2481_s30 = scalar_lea.sflag [#allocation12], %s449_s21 }
  0xa6   : > { %1645 = vmatprep.subr.mxu0 %v2052_v0  ;;  %1638 = vmatmul.mubr.msk.f32.vlgmr.msra.gmra.mrb[2].mxu0 %vm566_vm1, %v556_v11  ;;  %s1894_s17 = scalar_lea.vmem %s2471_s0, 512  ;;  %p2651_p6 = scmp.ne.s32.totalorder %s2634_s18, 0 }
  0xa7   : > { %1650 = vmatprep.subr.mxu1 %v2052_v0  ;;  %1647 = vmatprep.mubr.msk.f32.mxu0 %vm2053_vm0, %v2052_v0  ;;  %p1895_p1 = scmp.ne.s32.totalorder %s2471_s0, %s1894_s17  ;;  %s2054_s6 = smov [#allocation11]  }
  0xa8   : > { %1643 = vmatmul.mubr.msk.f32.vlgmr.msra.gmra.mrb[2].mxu1 %vm566_vm1, %v557_v12  ;;  %1646 = vmatpush3.msra.mxu0 %v931_v63  ;;  %v934_v12 = vld [vmem:[%s2373_s27 + $0x18] sm:$0xff]  ;;  %s2649_s27 = sld [smem:[#allocation29_spill]]  ;;  %s1898_s1 = sshll.u32 %s2054_s6, 4  ;;  %s1899_s1 = int_to_ptr.vmem [resolvable:$false] %s1898_s1 }
  0xa9   : > { %1652 = vmatprep.mubr.msk.f32.mxu1 %vm2053_vm0, %v2052_v0  ;;  %1655 = vmatprep.subr.mxu0 %v2052_v0  ;;  %p1896_p13 = pnand %p1895_p1, %p2651_p6  ;;  %s1900_s15 = scalar_lea.vmem %s1899_s1, 1024 }
  0xaa   : > { %1651 = vmatpush3.msra.mxu1 %v932_v1  ;;  %p1901_p2 = scmp.lt.s32.totalorder %s2471_s0, %s1899_s1  ;;  %p1902_p5 = scmp.lt.s32.totalorder %s1900_s15, %s1894_s17 }
  0xab   : > { %1660 = vmatprep.subr.mxu1 %v2052_v0  ;;  %p1897_p11 = pneg %p1896_p13 }
  0xac   : > { %p1903_p7 = por %p1902_p5, %p1901_p2 }
  0xae   : > { %s2650_s16 = smov %s2649_s27  ;;  %s2477_s29 = scalar_lea.hbm %s2649_s27, %s2463_s14 }
  0xaf   : > { %p1904_p3 = pnand %p1903_p7, %p1897_p11 }
 0x175   : > { %v636_v15 = vpop.f32.mrb[0].mxu0 }
 0x176   : > { %v637_v17 = vadd.f32 %v636_v15, %v562_v13  ;;  %v1629_v18 = vpop.f32.mrb[1].mxu0 }
 0x177   : > { %v709_v19 = vpop.f32.mrb[0].mxu1 }
 0x178   : > { %v710_v20 = vadd.f32 %v709_v19, %v563_v14  ;;  %v1634_v22 = vpop.f32.mrb[1].mxu1  ;;  %v860_v24 = vadd.f32 %v859_v16, %v637_v17 }
 0x179   : > { %v782_v27 = vpop.f32.mrb[2].mxu0 }
 0x17a   : > { %v861_v26 = vadd.f32 %v859_v16, %v710_v20  ;;  %v783_v28 = vadd.f32 %v782_v27, %v564_v23  ;;  %v1639_v29 = vpop.f32.mrb[3].mxu0  ;;  %v871_v31 = vadd.f32 %v1586_v21, %v860_v24 }
 0x17b   : > { %v855_v30 = vpop.f32.mrb[2].mxu1 }
 0x17c   : > { %v872_v32 = vadd.f32 %v1586_v21, %v861_v26  ;;  %v856_v33 = vadd.f32 %v855_v30, %v565_v25  ;;  %v1644_v34 = vpop.f32.mrb[3].mxu1  ;;  %v862_v35 = vadd.f32 %v859_v16, %v783_v28  ;;  %v879_v36 = vsel %vm566_vm1, %v871_v31, -inf  ;;  %875 = vst.msk [vmem:[%s2423_s23] sm:$0xff] %vm566_vm1, %v871_v31 }
 0x17d   : > { %880 = vmax.xlane.f32.xlu0 %v879_v36 }
 0x17e   : > { %876 = vst.msk [vmem:[%s2423_s23 + $0x8] sm:$0xff] %vm566_vm1, %v872_v32  ;;  %v863_v37 = vadd.f32 %v859_v16, %v856_v33  ;;  %v882_v38 = vsel %vm566_vm1, %v872_v32, -inf  ;;  %v873_v39 = vadd.f32 %v1586_v21, %v862_v35 }
 0x180   : > { %v874_v40 = vadd.f32 %v1586_v21, %v863_v37  ;;  %v885_v41 = vsel %vm566_vm1, %v873_v39, -inf  ;;  %877 = vst.msk [vmem:[%s2423_s23 + $0x10] sm:$0xff] %vm566_vm1, %v873_v39 }
 0x181   : > { %883 = vmax.xlane.f32.xlu0 %v882_v38  ;;  %886 = vmax.xlane.f32.xlu1 %v885_v41 }
 0x182   : > { %878 = vst.msk [vmem:[%s2423_s23 + $0x18] sm:$0xff] %vm566_vm1, %v874_v40  ;;  %v888_v42 = vsel %vm566_vm1, %v874_v40, -inf }
 0x185   : > { %889 = vmax.xlane.f32.xlu1 %v888_v42 }
 0x20a   : > { %v881_v43 = vpop.xlane.xlu0 %880 }
 0x20b   : > { %v891_v44 = vsub.f32 %v871_v31, %v881_v43 }
 0x20d   : > { %v895_v45 = vmul.f32 1.442695, %v891_v44 }
 0x20e   : > { %v884_v46 = vpop.xlane.xlu0 %883  ;;  %v887_v47 = vpop.xlane.xlu1 %886 }
 0x20f   : > { %1758 = vpow2.f32 %v895_v45  ;;  %v892_v48 = vsub.f32 %v872_v32, %v884_v46  ;;  %v893_v49 = vsub.f32 %v873_v39, %v887_v47 }
 0x211   : > { %v897_v50 = vmul.f32 1.442695, %v892_v48  ;;  %v899_v51 = vmul.f32 1.442695, %v893_v49 }
 0x212   : > { %v890_v52 = vpop.xlane.xlu1 %889 }
 0x213   : > { %1760 = vpow2.f32 %v897_v50  ;;  %v894_v53 = vsub.f32 %v874_v40, %v890_v52 }
 0x214   : > { %1762 = vpow2.f32 %v899_v51 }
 0x215   : > { %v901_v54 = vmul.f32 1.442695, %v894_v53 }
 0x217   : > { %1764 = vpow2.f32 %v901_v54 }
 0x219   : > { %v1759_v55 = vpop.eup %1758 }
 0x21a   : > { %v903_v56 = vsel %vm566_vm1, %v1759_v55, 0.0 }
 0x21b   : > { %904 = vadd.xlane.f32.xlu0 %v903_v56 }
 0x21d   : > { %v1761_v57 = vpop.eup %1760 }
 0x21e   : > { %v1763_v58 = vpop.eup %1762  ;;  %v906_v59 = vsel %vm566_vm1, %v1761_v57, 0.0 }
 0x21f   : > { %907 = vadd.xlane.f32.xlu1 %v906_v59  ;;  %v909_v60 = vsel %vm566_vm1, %v1763_v58, 0.0 }
 0x220   : > { %910 = vadd.xlane.f32.xlu0 %v909_v60 }
 0x221   : > { %v1765_v61 = vpop.eup %1764 }
 0x222   : > { %v912_v62 = vsel %vm566_vm1, %v1765_v61, 0.0 }
 0x223   : > { %913 = vadd.xlane.f32.xlu1 %v912_v62 }
 0x2a8   : > { %v905_v2 = vpop.xlane.xlu0 %904 }
 0x2a9   : > { %1766 = vrcp.f32 %v905_v2 }
 0x2ac   : > { %v908_v3 = vpop.xlane.xlu1 %907 }
 0x2ad   : > { %v911_v4 = vpop.xlane.xlu0 %910  ;;  %1768 = vrcp.f32 %v908_v3 }
 0x2ae   : > { %1770 = vrcp.f32 %v911_v4 }
 0x2b0   : > { %v914_v5 = vpop.xlane.xlu1 %913 }
 0x2b1   : > { %1772 = vrcp.f32 %v914_v5 }
 0x2b3   : > { %v1767_v6 = vpop.eup %1766 }
 0x2b4   : > { %v923_v7 = vmul.f32 %v1767_v6, %v1759_v55 }
 0x2b6   : > { %927 = vst.msk [vmem:[%s528_s20] sm:$0xff] %vm566_vm1, %v923_v7  ;;  %1648 = vmatmul.mubr.msk.f32.vlgmr.msra.gmra.mrb[4].mxu0 %vm566_vm1, %v923_v7 }
 0x2b7   : > { %v1769_v9 = vpop.eup %1768  ;;  %1656 = vmatpush3.msra.mxu0 %v933_v8  ;;  %1657 = vmatprep.mubr.msk.f32.mxu0 %vm2053_vm0, %v2052_v0 }
 0x2b8   : > { %v1771_v10 = vpop.eup %1770  ;;  %v924_v11 = vmul.f32 %v1769_v9, %v1761_v57 }
 0x2b9   : > { %v925_v13 = vmul.f32 %v1771_v10, %v1763_v58 }
 0x2ba   : > { %928 = vst.msk [vmem:[%s528_s20 + $0x8] sm:$0xff] %vm566_vm1, %v924_v11  ;;  %1653 = vmatmul.mubr.msk.f32.vlgmr.msra.gmra.mrb[4].mxu1 %vm566_vm1, %v924_v11 }
 0x2bb   : > { %v1773_v14 = vpop.eup %1772  ;;  %929 = vst.msk [vmem:[%s528_s20 + $0x10] sm:$0xff] %vm566_vm1, %v925_v13  ;;  %1658 = vmatmul.mubr.msk.f32.vlgmr.msra.gmra.mrb[6].mxu0 %vm566_vm1, %v925_v13  ;;  %1661 = vmatpush3.msra.mxu1 %v934_v12 }
 0x2bc   : > { %v926_v15 = vmul.f32 %v1773_v14, %v1765_v61  ;;  %1662 = vmatprep.mubr.msk.f32.mxu1 %vm2053_vm0, %v2052_v0 }
 0x2be   : > { %930 = vst.msk [vmem:[%s528_s20 + $0x18] sm:$0xff] %vm566_vm1, %v926_v15  ;;  %1663 = vmatmul.mubr.msk.f32.vlgmr.msra.gmra.mrb[6].mxu1 %vm566_vm1, %v926_v15 }
 0x2bf   : > { %1907 = shalt.err (!%p1904_p3)
}
 0x2c0   : > { %s1908_s11 = scalar_lea.hbm %s2469_s13, 512  ;;  %s1912_s25 = scalar_lea.hbm %s2605_s7, 1024 }
 0x2c1   : > { %p1909_p10 = scmp.ne.s32.totalorder %s2469_s13, %s1908_s11  ;;  %p1913_p4 = scmp.lt.u32.totalorder %s2469_s13, %s2605_s7 }
 0x2c2   : > { %p1914_p8 = scmp.lt.u32.totalorder %s1912_s25, %s1908_s11  ;;  %p1916_p1 = scmp.lt.u32.totalorder %s1908_s11, %s2469_s13 }
 0x2c3   : > { %p1910_p9 = pnand %p1909_p10, %p2651_p6 }
 0x2c4   : > { %p1915_p0 = por %p1914_p8, %p1913_p4 }
 0x2c5   : > { %p1911_p12 = pneg %p1910_p9 }
 0x2c6   : > { %p1917_p13 = por %p1916_p1, %p1915_p0 }
 0x2c8   : > { %p1918_p11 = pnand %p1917_p13, %p1911_p12 }
 0x2ca   : > { %1921 = shalt.err (!%p1918_p11)
}
 0x2cb   : > { %s2055_s10 = smov 128   ;;  %s2056_s24 = smov 8  }
 0x2cc   : > { %1674 = dma.vmem_to_hbm [thread:$0]  (%p2651_p6), %s2471_s0, 512, %s2469_s13, %s2481_s30, %s2055_s10, %s2055_s10, %s2056_s24  }
 0x2cd   : > { %s1922_s12 = scalar_lea.vmem %s2460_s22, 512  ;;  %s2057_s8 = smov [#allocation13]  }
 0x2ce   : > { %p1923_p2 = scmp.ne.s32.totalorder %s2460_s22, %s1922_s12  ;;  %s1926_s27 = sshll.u32 %s2057_s8, 4  ;;  %s1927_s27 = int_to_ptr.vmem [resolvable:$false] %s1926_s27 }
 0x2cf   : > { %s1928_s17 = scalar_lea.vmem %s1927_s27, 1024  ;;  %p1929_p3 = scmp.lt.s32.totalorder %s2460_s22, %s1927_s27 }
 0x2d0   : > { %p1924_p5 = pnand %p1923_p2, %p2651_p6  ;;  %p1930_p10 = scmp.lt.s32.totalorder %s1928_s17, %s1922_s12 }
 0x2d2   : > { %p1925_p7 = pneg %p1924_p5  ;;  %p1931_p9 = por %p1930_p10, %p1929_p3 }
 0x2d4   : > { %p1932_p12 = pnand %p1931_p9, %p1925_p7 }
 0x2d6   : > { %1935 = shalt.err (!%p1932_p12)
}
 0x2d7   : > { %s1936_s0 = scalar_lea.hbm %s2477_s29, 512  ;;  %s1940_s1 = scalar_lea.hbm %s2650_s16, 1024 }
 0x2d8   : > { %p1937_p4 = scmp.ne.s32.totalorder %s2477_s29, %s1936_s0  ;;  %p1941_p1 = scmp.lt.u32.totalorder %s2477_s29, %s2650_s16 }
 0x2d9   : > { %p1942_p13 = scmp.lt.u32.totalorder %s1940_s1, %s1936_s0  ;;  %p1944_p2 = scmp.lt.u32.totalorder %s1936_s0, %s2477_s29 }
 0x2da   : > { %p1938_p8 = pnand %p1937_p4, %p2651_p6 }
 0x2db   : > { %p1943_p11 = por %p1942_p13, %p1941_p1 }
 0x2dc   : > { %p1939_p0 = pneg %p1938_p8 }
 0x2dd   : > { %p1945_p5 = por %p1944_p2, %p1943_p11 }
 0x2df   : > { %p1946_p7 = pnand %p1945_p5, %p1939_p0 }
 0x2e1   : > { %1949 = shalt.err (!%p1946_p7)
}
 0x2e2   : > { %1675 = dma.vmem_to_hbm [thread:$0]  (%p2651_p6), %s2460_s22, 512, %s2477_s29, %s2481_s30, %s2055_s10, %s2055_s10, %s2056_s24  }
 0x2e3   : > { %s521_s21 = scalar_lea.vmem [#allocation10], %s2354_s26  ;;  %s2652_s29 = sld [smem:[#allocation28_spill]] }
 0x2e4   : > { %s1258_s9 = sshll.u32 %s521_s21, 4  ;;  %s1232_s23 = scalar_lea.sflag [#allocation4], %s2351_s19  ;;  %s2536_s9 = int_to_ptr.vmem [resolvable:$true] %s1258_s9 }
 0x2e5   : > { %s1950_s20 = scalar_lea.vmem %s2536_s9, 512  ;;  %s2058_s12 = smov [#allocation10]  }
 0x2e6   : > { %p1951_p3 = scmp.ne.s32.totalorder %s2536_s9, %s1950_s20  ;;  %s1954_s8 = sshll.u32 %s2058_s12, 4  ;;  %s1955_s8 = int_to_ptr.vmem [resolvable:$false] %s1954_s8 }
 0x2e7   : > { %s1956_s27 = scalar_lea.vmem %s1955_s8, 1024  ;;  %p1957_p12 = scmp.lt.s32.totalorder %s2536_s9, %s1955_s8 }
 0x2e8   : > { %p1952_p10 = pnand %p1951_p3, %p2651_p6  ;;  %p1958_p4 = scmp.lt.s32.totalorder %s1956_s27, %s1950_s20 }
 0x2e9   : > { %s2653_s25 = smov %s2652_s29  ;;  %s2543_s30 = scalar_lea.hbm %s2652_s29, %s2463_s14 }
 0x2ea   : > { %p1953_p9 = pneg %p1952_p10  ;;  %p1959_p8 = por %p1958_p4, %p1957_p12 }
 0x2ec   : > { %p1960_p0 = pnand %p1959_p8, %p1953_p9 }
 0x389   : > { %v1004_v0 = vpop.f32.mrb[4].mxu0 }
 0x38a   : > { %1227 = vst.msk [vmem:[%s521_s21] sm:$0xff] %vm566_vm1, %v1004_v0  ;;  %v1649_v16 = vpop.f32.mrb[5].mxu0 }
 0x38d   : > { %v1077_v17 = vpop.f32.mrb[4].mxu1 }
 0x38e   : > { %1228 = vst.msk [vmem:[%s521_s21 + $0x8] sm:$0xff] %vm566_vm1, %v1077_v17  ;;  %v1150_v18 = vpop.f32.mrb[6].mxu0  ;;  %v1654_v19 = vpop.f32.mrb[5].mxu1 }
 0x38f   : > { %1229 = vst.msk [vmem:[%s521_s21 + $0x10] sm:$0xff] %vm566_vm1, %v1150_v18  ;;  %v1659_v20 = vpop.f32.mrb[7].mxu0 }
 0x391   : > { %v1223_v21 = vpop.f32.mrb[6].mxu1 }
 0x392   : > { %1230 = vst.msk [vmem:[%s521_s21 + $0x18] sm:$0xff] %vm566_vm1, %v1223_v21  ;;  %v1664_v22 = vpop.f32.mrb[7].mxu1 }
 0x393   : > { %1963 = shalt.err (!%p1960_p0)
}
 0x394   : > { %s1964_s14 = scalar_lea.hbm %s2543_s30, 512  ;;  %s1968_s13 = scalar_lea.hbm %s2653_s25, 1024 }
 0x395   : > { %p1965_p1 = scmp.ne.s32.totalorder %s2543_s30, %s1964_s14  ;;  %p1969_p2 = scmp.lt.u32.totalorder %s2543_s30, %s2653_s25 }
 0x396   : > { %p1970_p5 = scmp.lt.u32.totalorder %s1968_s13, %s1964_s14  ;;  %p1972_p3 = scmp.lt.u32.totalorder %s1964_s14, %s2543_s30 }
 0x397   : > { %p1966_p13 = pnand %p1965_p1, %p2651_p6 }
 0x398   : > { %p1971_p7 = por %p1970_p5, %p1969_p2 }
 0x399   : > { %p1967_p11 = pneg %p1966_p13 }
 0x39a   : > { %p1973_p10 = por %p1972_p3, %p1971_p7 }
 0x39c   : > { %p1974_p9 = pnand %p1973_p10, %p1967_p11 }
 0x39e   : > { %1977 = shalt.err (!%p1974_p9)
}
 0x39f   : > { %1673 = dma.vmem_to_hbm [thread:$0]  (%p2651_p6), %s2536_s9, 512, %s2543_s30, %s1232_s23, %s2055_s10, %s2055_s10, %s2056_s24  }
 0x3a0 PF: > { %s2654_s15 = sld [smem:[#allocation19_spill]]  ;;  %s2655_s11 = sld [smem:[#allocation25_spill]] }
 0x3a1   : > { %s2656_s21 = sld [smem:[#allocation22_spill]] }
 0x3a6   : > { %s1311_s22 = sand.u32 1, %s2654_s15   ;;  %p2657_p12 = scmp.ne.s32.totalorder %s2655_s11, 0 }
 0x3a7   : > { %p2658_p4 = scmp.ge.s32.totalorder %s2656_s21, 2  ;;  %s1312_s26 = scalar_lea.sflag [#allocation4], %s1311_s22 }
 0x3a9   : > { %p1693_p8 = pnand %p2658_p4, %p2657_p12 }
 0x3ab   : > { %2015 = dma.done.wait (!%p1693_p8), %s1312_s26, 512  }
 0x3ac   : > { %2017 = vsyncadd (!%p1693_p8), %s1312_s26, 4294966784  ;;  %s2659_s18 = sadd.s32 4294967294, %s2656_s21  }
 0x3ad   : > { %s1320_s29 = sand.u32 1, %s2659_s18  }
 0x3ae   : > { %s1321_s20 = scalar_lea.sflag [#allocation12], %s1320_s29 }
 0x3af   : > { %2019 = dma.done.wait (!%p1693_p8), %s1321_s20, 1024  }
 0x3b0   : > { %2021 = vsyncadd (!%p1693_p8), %s1321_s20, 4294966272  ;;  %s34_s10 = sadd.s32 1, %s2656_s21   ;;  %s2660_s19 = sld [smem:[#allocation20_spill]] }
 0x3b1   : > { %p31_p6 = scmp.ge.s32.totalorder %s34_s10, 4   ;;  %s2661_s29 = sld [smem:[#allocation24_spill]] }
 0x3b2   : > { %s2662_s30 = sld [smem:[#allocation21_spill]]  ;;  %s2663_s9 = sld [smem:[#allocation23_spill]] }
 0x3b3   : > { %s2664_s27 = smov %s2028_s28  ;;  %33 = sbr.rel (!%p31_p6) target bundleno = 17 (0x11), region = 164 }
 0x3b6   : > { %s2665_s28 = smov %s2660_s19 }
 0x3ba   :  { %1335 = vsyncpa [#allocation3], 1 }
 0x3bb   :  { %1337 = vsyncpa [#allocation3 + $0x1], 1 }
 0x3bc   :  { %1338 = vsyncpa [#allocation6], 1 }
 0x3bd   :  { %1340 = vsyncpa [#allocation6 + $0x1], 1 }
 0x3be   :  { %1341 = vsyncpa [#allocation9], 1 }
 0x3bf   :  { %1343 = vsyncpa [#allocation9 + $0x1], 1 }
 0x3c0   :  { %1344 = vsyncpa [#allocation4], 1 }
 0x3c1   :  { %1346 = vsyncpa [#allocation4 + $0x1], 1 }
 0x3c2   :  { %1347 = vsyncpa [#allocation12], 1 }
 0x3c3   :  { %1349 = vsyncpa [#allocation12 + $0x1], 1 }

</bundles_post_ra>
